<compile_context>
chip_gen: v5e
topology: v5e:2x2
jax: 0.10.0
libtpu: 0.0.40
codegen_flags: <defaults>
</compile_context>

<pallas_src>
import jax
import jax.numpy as jnp
from jax import lax
from jax.experimental import pallas as pl
from jax.experimental.pallas import tpu as pltpu

N_ACTION = 32            # n_action (input / output feature dim)
HIDDEN = 256             # fc1 width
PREFERRED_TILE_B = 1024  # upper bound on the batch tile (review: sweep 512-2048)


def mlp_kernel(x_ref, w1_ref, b1_ref, w2t_ref, b2_ref, o_ref):
    # x:   [tile_b, n_action] f32 (or bf16)
    # w1:  [n_action, HIDDEN] bf16      b1: [1, HIDDEN]   f32
    # w2t: [n_action, HIDDEN] bf16      b2: [1, n_action] f32
    # o:   [tile_b, n_action] f32
    x = x_ref[...].astype(jnp.bfloat16)  # no-op if caller already feeds bf16
    # fc1 + bias + ReLU: bf16 operands on the MXU, f32 accumulation.
    h = jnp.dot(x, w1_ref[...], preferred_element_type=jnp.float32) + b1_ref[...]
    h = jnp.maximum(h, 0.0)
    # fc2 with transposed weights: contract the HIDDEN dims (both lane-dense).
    out = lax.dot_general(
        h.astype(jnp.bfloat16), w2t_ref[...],
        dimension_numbers=(((1,), (1,)), ((), ())),
        preferred_element_type=jnp.float32)
    o_ref[...] = (out + b2_ref[...]).astype(o_ref.dtype)


def _pick_tile_b(batch, preferred=PREFERRED_TILE_B):
    """Largest multiple-of-128 batch tile <= `preferred` that still leaves the
    parallel grid with >= 2 steps (so v7x's two TensorCores both get work)."""
    half = (batch // 2) // 128 * 128
    return max(128, min(preferred, half))


def mlp_forward(x, params):
    """Fused fc1 -> ReLU -> fc2. Returns [B, N_ACTION] float32."""
    w1, b1, w2t, b2 = params
    B, n_in = x.shape
    n_out = w2t.shape[0]

    if B <= 128:
        # Latency path: single tile, no grid, no pipeline/double-buffer
        # machinery -- the whole ~80 KiB working set lives in VMEM.
        return pl.pallas_call(
            mlp_kernel,
            out_shape=jax.ShapeDtypeStruct((B, n_out), jnp.float32),
            in_specs=[pl.BlockSpec(memory_space=pltpu.MemorySpace.VMEM)] * 5,
            out_specs=pl.BlockSpec(memory_space=pltpu.MemorySpace.VMEM),
        )(x, w1, b1, w2t, b2)

    # Throughput path: large batch tiles, "parallel" grid axis (megacore /
    # v7x 2-TC sharding).  Weight/bias BlockSpecs always map to block (0, 0),
    # so they stay VMEM-resident across the whole grid.  Ragged final tile is
    # handled by the pl.cdiv grid (OOB output rows are dropped by Pallas).
    tile_b = _pick_tile_b(B)
    return pl.pallas_call(
        mlp_kernel,
        out_shape=jax.ShapeDtypeStruct((B, n_out), jnp.float32),
        grid_spec=pl.GridSpec(
            grid=(pl.cdiv(B, tile_b),),
            in_specs=[
                pl.BlockSpec((tile_b, n_in), lambda i: (i, 0)),
                pl.BlockSpec(w1.shape, lambda i: (0, 0)),
                pl.BlockSpec(b1.shape, lambda i: (0, 0)),
                pl.BlockSpec(w2t.shape, lambda i: (0, 0)),
                pl.BlockSpec(b2.shape, lambda i: (0, 0)),
            ],
            out_specs=pl.BlockSpec((tile_b, n_out), lambda i: (i, 0)),
        ),
        compiler_params=pltpu.CompilerParams(
            dimension_semantics=("parallel",)),
    )(x, w1, b1, w2t, b2)


def init_params(key, n_action=N_ACTION, hidden=HIDDEN):
    # nn.Linear-style init: U(-1/sqrt(fan_in), 1/sqrt(fan_in)).
    k1, k2, k3, k4 = jax.random.split(key, 4)
    lim1 = 1.0 / jnp.sqrt(n_action)
    lim2 = 1.0 / jnp.sqrt(hidden)
    w1 = jax.random.uniform(k1, (n_action, hidden), jnp.float32, -lim1, lim1)
    b1 = jax.random.uniform(k2, (1, hidden), jnp.float32, -lim1, lim1)
    w2 = jax.random.uniform(k3, (hidden, n_action), jnp.float32, -lim2, lim2)
    b2 = jax.random.uniform(k4, (1, n_action), jnp.float32, -lim2, lim2)
    return w1, b1, w2, b2


def prepare_params(w1, b1, w2, b2):
    """Kernel-side layout: bf16 matmul weights, w2 transposed to
    [n_out, HIDDEN] (lane-dense contraction dim); biases stay f32.
    No output-lane padding anymore."""
    w2t = jnp.asarray(w2.T)                     # [n_out, HIDDEN]
    return (w1.astype(jnp.bfloat16), b1, w2t.astype(jnp.bfloat16), b2)


if __name__ == "__main__":
    key = jax.random.PRNGKey(0)
    kx, kp = jax.random.split(key)
    w1, b1, w2, b2 = init_params(kp)
    params = prepare_params(w1, b1, w2, b2)

    def ref_fn(x):  # pure-JAX f32 reference of the PyTorch forward
        return jnp.maximum(x @ w1 + b1, 0.0) @ w2 + b2

    # Exercise all paths: latency (no grid), ragged throughput tile, and an
    # evenly-divided 2-step parallel grid.
    for batch in (8, 300, 512):
        x = jax.random.normal(kx, (batch, N_ACTION), jnp.float32)
        out = jax.block_until_ready(mlp_forward(x, params))
        ref = ref_fn(x)
        assert out.shape == (batch, N_ACTION)
        # bf16 matmul operands (f32 accumulation) -> loosened tolerance.
        assert jnp.allclose(out, ref, atol=2e-2, rtol=2e-2), (
            f"mismatch at batch={batch}: "
            f"max abs err {float(jnp.max(jnp.abs(out - ref)))}")

    print("KERNEL_OK")
</pallas_src>

<mosaic_0001>
module attributes {stable_mosaic.version = 11 : i64} {
  func.func @mlp_kernel(%arg0: memref<8x32xf32, #tpu.memory_space<vmem>>, %arg1: memref<32x256xbf16, #tpu.memory_space<vmem>>, %arg2: memref<1x256xf32, #tpu.memory_space<vmem>>, %arg3: memref<32x256xbf16, #tpu.memory_space<vmem>>, %arg4: memref<1x32xf32, #tpu.memory_space<vmem>>, %arg5: memref<8x32xf32, #tpu.memory_space<vmem>>) attributes {dimension_semantics = [], scalar_prefetch = 0 : i64, scratch_operands = 0 : i64, tpu.core_type = #tpu.core_type<tc>} {
    %c0 = arith.constant 0 : index
    %c0_0 = arith.constant 0 : index
    %0 = vector.load %arg0[%c0, %c0_0] : memref<8x32xf32, #tpu.memory_space<vmem>>, vector<8x32xf32>
    %1 = arith.truncf %0 : vector<8x32xf32> to vector<8x32xbf16>
    %c0_1 = arith.constant 0 : index
    %c0_2 = arith.constant 0 : index
    %2 = vector.load %arg1[%c0_1, %c0_2] : memref<32x256xbf16, #tpu.memory_space<vmem>>, vector<32x256xbf16>
    %cst = arith.constant dense<0.000000e+00> : vector<8x256xf32>
    %3 = tpu.matmul %1, %2, %cst {dimension_numbers = #tpu.dot_dimension_numbers<[1], [0], [0], [1], [0, 0, 1, 1], [], []>} : vector<8x32xbf16>, vector<32x256xbf16>, vector<8x256xf32> -> vector<8x256xf32>
    %c0_3 = arith.constant 0 : index
    %c0_4 = arith.constant 0 : index
    %4 = vector.load %arg2[%c0_3, %c0_4] : memref<1x256xf32, #tpu.memory_space<vmem>>, vector<1x256xf32>
    %5 = vector.broadcast %4 : vector<1x256xf32> to vector<8x256xf32>
    %6 = arith.addf %3, %5 : vector<8x256xf32>
    %cst_5 = arith.constant 0.000000e+00 : f32
    %7 = vector.broadcast %cst_5 : f32 to vector<8x256xf32>
    %8 = arith.maximumf %6, %7 : vector<8x256xf32>
    %9 = arith.truncf %8 : vector<8x256xf32> to vector<8x256xbf16>
    %c0_6 = arith.constant 0 : index
    %c0_7 = arith.constant 0 : index
    %10 = vector.load %arg3[%c0_6, %c0_7] : memref<32x256xbf16, #tpu.memory_space<vmem>>, vector<32x256xbf16>
    %cst_8 = arith.constant dense<0.000000e+00> : vector<8x32xf32>
    %11 = tpu.matmul %9, %10, %cst_8 {dimension_numbers = #tpu.dot_dimension_numbers<[1], [1], [0], [0], [0, 0, 1, 0], [], []>} : vector<8x256xbf16>, vector<32x256xbf16>, vector<8x32xf32> -> vector<8x32xf32>
    %c0_9 = arith.constant 0 : index
    %c0_10 = arith.constant 0 : index
    %12 = vector.load %arg4[%c0_9, %c0_10] : memref<1x32xf32, #tpu.memory_space<vmem>>, vector<1x32xf32>
    %13 = vector.broadcast %12 : vector<1x32xf32> to vector<8x32xf32>
    %14 = arith.addf %11, %13 : vector<8x32xf32>
    %c0_11 = arith.constant 0 : index
    %c0_12 = arith.constant 0 : index
    %15 = vector.load %arg5[%c0_11, %c0_12] : memref<8x32xf32, #tpu.memory_space<vmem>>, vector<8x32xf32>
    tpu.vector_store %arg5[%c0_11, %c0_12], %14 {strides = array<i32>} : memref<8x32xf32, #tpu.memory_space<vmem>>, vector<8x32xf32>,
    return
  }
}

</mosaic_0001>

<bundles_post_ra>
// kernel: tpu_custom_call.1
= control target key start
LH: loop header
LB: loop body
LE: loop exit
PB: predicated region body
PF: predicated region fallthrough
CT: control target
= control target key end

     0   :  { %10 = vsyncpa [#allocation3], 0  ;;  %s457_s0 = inlined_call_operand.hbm [shape: f32[8,32], index: 0, kind: input, shape index: {}]   ;;  %s458_s1 = inlined_call_operand.hbm [shape: bf16[32,256], index: 1, kind: input, shape index: {}]   ;;  %s459_s2 = inlined_call_operand.hbm [shape: f32[1,256], index: 2, kind: input, shape index: {}]   ;;  %s460_s3 = inlined_call_operand.hbm [shape: bf16[32,256], index: 3, kind: input, shape index: {}]   ;;  %s461_s4 = inlined_call_operand.vmem [shape: f32[1,32], index: 4, kind: input, shape index: {}]   ;;  %s462_s5 = inlined_call_operand.hbm [shape: f32[8,32], index: 5, kind: output, shape index: {}]  }
   0x1   :  { %11 = vsyncpa [#allocation6], 0 }
   0x2   :  { %12 = vsyncpa [#allocation9], 0  ;;  %s29_s20 = sshll.u32 %s458_s1, 4  ;;  %s30_s20 = int_to_ptr.hbm [resolvable:$true] %s29_s20 }
   0x3   :  { %13 = vsyncpa [#allocation4], 0  ;;  %s399_s21 = smov [#allocation5]   ;;  %s19_s25 = sshll.u32 %s457_s0, 4  ;;  %s20_s25 = int_to_ptr.hbm [resolvable:$true] %s19_s25 }
   0x4   :  { %s31_s22 = sshll.u32 %s399_s21, 4  ;;  %s400_s26 = smov 128   ;;  %s32_s22 = int_to_ptr.vmem [resolvable:$true] %s31_s22 }
   0x5   :  { %s401_s27 = smov 8   ;;  %s402_s28 = smov [#allocation2]  }
   0x6   :  { %37 = dma.hbm_to_vmem [thread:$0]  %s30_s20, 512, %s32_s22, [#allocation6], %s400_s26, %s400_s26, %s401_s27  }
   0x7   :  { %s21_s29 = sshll.u32 %s402_s28, 4  ;;  %s43_s7 = sshll.u32 %s459_s2, 4  ;;  %s22_s29 = int_to_ptr.vmem [resolvable:$true] %s21_s29  ;;  %s44_s7 = int_to_ptr.hbm [resolvable:$true] %s43_s7 }
   0x8   :  { %24 = dma.hbm_to_vmem [thread:$0]  %s20_s25, 128, %s22_s29, [#allocation3]  }
   0x9   :  { %s53_s9 = sshll.u32 %s460_s3, 4  ;;  %s403_s10 = smov [#allocation7]   ;;  %s54_s9 = int_to_ptr.hbm [resolvable:$true] %s53_s9 }
   0xa   :  { %s45_s11 = sshll.u32 %s403_s10, 4  ;;  %s404_s0 = smov [#allocation8]   ;;  %s46_s11 = int_to_ptr.vmem [resolvable:$true] %s45_s11 }
   0xb   :  { %48 = dma.hbm_to_vmem [thread:$0]  %s44_s7, 32, %s46_s11, [#allocation6]  }
   0xc   :  { %s55_s12 = sshll.u32 %s404_s0, 4  ;;  %s56_s12 = int_to_ptr.vmem [resolvable:$true] %s55_s12 }
   0xd   :  { %61 = dma.hbm_to_vmem [thread:$0]  %s54_s9, 512, %s56_s12, [#allocation9], %s400_s26, %s400_s26, %s401_s27  }
   0xe   :  { %391 = dma.done.wait [#allocation3], 128  }
   0xf   :  { %392 = vsyncadd [#allocation3], 4294967168 }
  0x10   :  { %393 = dma.done.wait [#allocation6], 544  }
  0x11   :  { %394 = vsyncadd [#allocation6], 4294966752 }
  0x12   :  { %395 = dma.done.wait [#allocation9], 512  }
  0x13   :  { %396 = vsyncadd [#allocation9], 4294966784  ;;  %v231_v0 = vld [vmem:[#allocation5 + $0x10] sm:$0xf]  ;;  %v258_v1 = vld [vmem:[#allocation5 + $0x14] sm:$0xf0] }
  0x14   :  { %v257_v2 = vld [vmem:[#allocation5 + $0x14] sm:$0xf]  ;;  %v232_v3 = vor.u32 %v258_v1, %v231_v0  ;;  %v233_v4 = vld [vmem:[#allocation5 + $0x18] sm:$0xf0]  ;;  %v223_v5 = vld [vmem:[#allocation5] sm:$0xf] }
  0x15   :  { %v256_v6 = vld [vmem:[#allocation5 + $0x4] sm:$0xf0]  ;;  %v236_v7 = vor.u32 %v257_v2, %v233_v4  ;;  %v255_v8 = vld [vmem:[#allocation5 + $0x4] sm:$0xf]  ;;  %v225_v9 = vld [vmem:[#allocation5 + $0x8] sm:$0xf0] }
  0x16   :  { %v81_v10 = vld [vmem:[#allocation2] sm:$0xff]  ;;  %123 = vmatpush.bf16.msra.mxu0 %v232_v3  ;;  %v224_v11 = vor.u32 %v256_v6, %v223_v5  ;;  %v249_v12 = vld [vmem:[#allocation8 + $0x10] sm:$0xf]  ;;  %v228_v15 = vor.u32 %v255_v8, %v225_v9  ;;  %vm113_vm0 = vcmask 261120   ;;  %v241_v20 = vld [vmem:[#allocation8] sm:$0xf] }
  0x17   :  { %v262_v13 = vld [vmem:[#allocation8 + $0x14] sm:$0xf0]  ;;  %v261_v14 = vld [vmem:[#allocation8 + $0x14] sm:$0xf]  ;;  %136 = vmatpush.bf16.msra.mxu1 %v236_v7  ;;  %v251_v17 = vld [vmem:[#allocation8 + $0x18] sm:$0xf0]  ;;  %v82_v19 = vpack.c.bf16 %v81_v10, %v81_v10 }
  0x18   :  { %v250_v16 = vor.u32 %v262_v13, %v249_v12  ;;  %v254_v18 = vor.u32 %v261_v14, %v251_v17  ;;  %v260_v21 = vld [vmem:[#allocation8 + $0x4] sm:$0xf0]  ;;  %v259_v22 = vld [vmem:[#allocation8 + $0x4] sm:$0xf]  ;;  %v243_v24 = vld [vmem:[#allocation8 + $0x8] sm:$0xf0] }
  0x19   :  { %v242_v23 = vor.u32 %v260_v21, %v241_v20  ;;  %v246_v25 = vor.u32 %v259_v22, %v243_v24  ;;  %v87_v26 = vld [vmem:[#allocation7] sm:$0x3]  ;;  %v270_v39 = vld [vmem:[%s461_s4] ss:$0 sm:$0xff]  ;;  %s405_s13 = smov [#allocation10]   ;;  %s209_s17 = sshll.u32 %s462_s5, 4  ;;  %s210_s17 = int_to_ptr.hbm [resolvable:$true] %s209_s17 }
  0x1a   :  { %181 = vmatpush.bf16.xpose.msra.mxu2 %v250_v16  ;;  %124 = vmatpush.bf16.msra.mxu0 %v224_v11  ;;  %v89_v27 = vperm.slane %v87_v26, 0  ;;  %v90_v28 = vperm.slane %v87_v26, 1  ;;  %s207_s14 = sshll.u32 %s405_s13, 4  ;;  %s208_s14 = int_to_ptr.vmem [resolvable:$true] %s207_s14 }
  0x1b   :  { %194 = vmatpush.bf16.xpose.msra.mxu3 %v254_v18  ;;  %137 = vmatpush.bf16.msra.mxu1 %v228_v15 }
  0x1d   :  { %237 = vmatmul.msk.bf16.vlgmr.msra.gmra.mxu0 %vm113_vm0, %v82_v19 }
  0x1e   :  { %238 = vmatmul.msk.bf16.vlgmr.msra.gmra.mxu1 %vm113_vm0, %v82_v19 }
  0x22   :  { %182 = vmatpush.bf16.xpose.msra.mxu2 %v242_v23 }
  0x23   :  { %195 = vmatpush.bf16.xpose.msra.mxu3 %v246_v25 }
  0x9a   :  { %v126_v29 = vpop.f32.mrf.mxu0 }
  0x9b   :  { %v127_v30 = vadd.f32 %v126_v29, %v89_v27  ;;  %v139_v31 = vpop.f32.mrf.mxu1 }
  0x9c   :  { %v140_v32 = vadd.f32 %v139_v31, %v90_v28 }
  0x9d   :  { %v143_v33 = vmax.f32 %v127_v30, 0.0 }
  0x9e   :  { %v144_v34 = vmax.f32 %v140_v32, 0.0 }
  0x9f   :  { %v145_v35 = vpack.c.bf16 %v143_v33, %v143_v33 }
  0xa0   :  { %v146_v36 = vpack.c.bf16 %v144_v34, %v144_v34 }
  0xa1   :  { %183 = vmatmul.bf16.vlgmr.msra.gmra.mxu2 %v145_v35 }
  0xa2   :  { %196 = vmatmul.bf16.vlgmr.msra.gmra.mxu3 %v146_v36  ;;  %v128_v37 = vpop.f32.mrf.mxu0 }
  0xa3   :  { %v141_v38 = vpop.f32.mrf.mxu1 }
 0x124   :  { %v184_v40 = vpop.f32.mrf.mxu2 }
 0x125   :  { %v185_v41 = vadd.f32 %v270_v39, %v184_v40  ;;  %v197_v42 = vpop.f32.mrf.mxu3 }
 0x127   :  { %v198_v43 = vadd.f32 %v197_v42, %v185_v41 }
 0x129   :  { %201 = vst.msk [vmem:[#allocation10] sm:$0xff] %vm113_vm0, %v198_v43 }
 0x12a   :  { %212 = dma.vmem_to_hbm [thread:$0]  %s208_s14, 128, %s210_s17, [#allocation4]  }
 0x12c   :  { %v186_v44 = vpop.f32.mrf.mxu2 }
 0x12d   :  { %v199_v45 = vpop.f32.mrf.mxu3 }
 0x12e   :  { %397 = dma.done.wait [#allocation4], 128  }
 0x12f   :  { %398 = vsyncadd [#allocation4], 4294967168 }
 0x130   :  { %217 = vsyncpa [#allocation3], 1 }
 0x131   :  { %218 = vsyncpa [#allocation6], 1 }
 0x132   :  { %219 = vsyncpa [#allocation9], 1 }
 0x133   :  { %220 = vsyncpa [#allocation4], 1 }

</bundles_post_ra>
